<compile_context>
chip_gen: v7x
topology: tpu7x:2x2x1
jax: 0.10.0
libtpu: 0.0.40
codegen_flags: <defaults>
</compile_context>

<pallas_src>
import jax
import jax.numpy as jnp
from jax.experimental import pallas as pl
from jax.experimental.pallas import tpu as pltpu


# --------------------------- Pallas kernel -----------------------------------

def _add_residual_kernel(w_ref, x_ref, r_ref, scale_ref, bias_ref, o_ref):
    # w_ref:     (Cout, Cin)       bf16  -- 1x1 conv weight (resident across grid)
    # x_ref:     (Cin,  hw_tile)         -- one batch element's lane tile
    # r_ref:     (Cout, hw_tile)         -- residual tile (same batch element)
    # scale_ref: (Cout, 1)         f32   -- folded BN scale
    # bias_ref:  (Cout, 1)         f32   -- folded conv-bias + BN shift
    # o_ref:     (Cout, hw_tile)
    x = x_ref[...].astype(jnp.bfloat16)               # in-kernel cast (no extra HBM pass)
    acc = jnp.dot(w_ref[...], x, preferred_element_type=jnp.float32)   # MXU, f32 acc
    z = (acc + r_ref[...].astype(jnp.float32)) * scale_ref[...] + bias_ref[...]
    o_ref[...] = jnp.maximum(z, 0.0).astype(o_ref.dtype)


# --------------------------- wrapper ------------------------------------------

def _pick_hw_tile(hw):
    # Largest lane-dense tile that divides HW; fall back to full extent.
    for t in (1024, 512, 256, 128):
        if hw % t == 0:
            return t
    # TODO(synk): pad HW up to a multiple of 128 (or fold N into lanes) for
    #             Inception spatial sizes like 17*17=289 / 8*8=64 to avoid
    #             masked vst.msk partial stores.
    return hw


def add_residual(x, residual, w, b, gamma, beta, running_mean, running_var,
                 eps=1e-5, out_dtype=None, hw_tile=None):
    """x: (N, Cin, H, W); residual: (N, Cout, H, W); w: (Cout, Cin, 1, 1); b: (Cout,).

    x / residual are read in the dtype they arrive in (pass bf16 from the
    producer for minimum HBM traffic); output defaults to x.dtype.
    """
    N, Cin, H, W = x.shape
    Cout = w.shape[0]
    HW = H * W
    out_dtype = x.dtype if out_dtype is None else out_dtype
    hw_tile = _pick_hw_tile(HW) if hw_tile is None else hw_tile
    n_hw = HW // hw_tile

    # Fold conv bias + eval-mode BN into per-channel scale/bias:
    #   BN(W@x + b + res) = s*(W@x + b + res) + t = (W@x + res)*s + (s*b + t)
    s = (gamma / jnp.sqrt(running_var + eps)).astype(jnp.float32)
    bias = (s * b + (beta - s * running_mean)).astype(jnp.float32)

    # Contiguous reshapes only (no data movement, no dtype converts).
    x2 = x.reshape(N, Cin, HW)
    r2 = residual.reshape(N, Cout, HW)
    wf = w.reshape(Cout, Cin).astype(jnp.bfloat16)     # tiny; cast in wrapper is fine

    # Advisory cost estimate (kernel is HBM-bound at small Cin).
    bytes_accessed = (x2.size * x2.dtype.itemsize
                      + r2.size * r2.dtype.itemsize
                      + N * Cout * HW * jnp.dtype(out_dtype).itemsize
                      + wf.size * wf.dtype.itemsize + 2 * Cout * 4)
    cost = pl.CostEstimate(flops=2 * N * Cout * Cin * HW + 5 * N * Cout * HW,
                           transcendentals=0,
                           bytes_accessed=bytes_accessed)

    out = pl.pallas_call(
        _add_residual_kernel,
        out_shape=jax.ShapeDtypeStruct((N, Cout, HW), out_dtype),
        grid=(N, n_hw),
        in_specs=[
            pl.BlockSpec((Cout, Cin), lambda n, t: (0, 0)),             # weight (shared)
            pl.BlockSpec((None, Cin, hw_tile), lambda n, t: (n, 0, t)),  # x[n] lane tile
            pl.BlockSpec((None, Cout, hw_tile), lambda n, t: (n, 0, t)), # residual tile
            pl.BlockSpec((Cout, 1), lambda n, t: (0, 0)),               # scale (shared)
            pl.BlockSpec((Cout, 1), lambda n, t: (0, 0)),               # bias  (shared)
        ],
        out_specs=pl.BlockSpec((None, Cout, hw_tile), lambda n, t: (n, 0, t)),
        compiler_params=pltpu.CompilerParams(
            dimension_semantics=("parallel", "parallel")),
        cost_estimate=cost,
    )(wf, x2, r2, s.reshape(Cout, 1), bias.reshape(Cout, 1))
    return out.reshape(N, Cout, H, W)


# --------------------------- pure-JAX reference --------------------------------

def add_residual_ref(x, residual, w, b, gamma, beta, mean, var, eps=1e-5):
    Cout, Cin = w.shape[0], w.shape[1]
    y = jnp.einsum("oc,nchw->nohw", w.reshape(Cout, Cin), x) + b[None, :, None, None]
    z = y + residual
    zn = (gamma[None, :, None, None] * (z - mean[None, :, None, None])
          / jnp.sqrt(var + eps)[None, :, None, None] + beta[None, :, None, None])
    return jnp.maximum(zn, 0.0)


# --------------------------- main ----------------------------------------------

if __name__ == "__main__":
    N, Cin, Cout, H, W = 2, 4, 32, 16, 16

    key = jax.random.PRNGKey(0)
    kx, kr, kw, kb, kg, kbe, km, kv = jax.random.split(key, 8)
    # Producer emits bf16 activations/residual -> bandwidth-optimal path (no
    # wrapper-side converts, bf16 reads/writes in the kernel).
    x = jax.random.normal(kx, (N, Cin, H, W), jnp.bfloat16)
    residual = jax.random.normal(kr, (N, Cout, H, W), jnp.bfloat16)
    w = 0.05 * jax.random.normal(kw, (Cout, Cin, 1, 1), jnp.float32)
    b = 0.1 * jax.random.normal(kb, (Cout,), jnp.float32)
    gamma = 1.0 + 0.1 * jax.random.normal(kg, (Cout,), jnp.float32)
    beta = 0.1 * jax.random.normal(kbe, (Cout,), jnp.float32)
    running_mean = 0.1 * jax.random.normal(km, (Cout,), jnp.float32)
    running_var = 1.0 + 0.1 * jax.random.uniform(kv, (Cout,), jnp.float32)

    out = add_residual(x, residual, w, b, gamma, beta, running_mean, running_var)
    out = jax.block_until_ready(out)
    assert out.shape == (N, Cout, H, W), out.shape
    assert out.dtype == jnp.bfloat16, out.dtype

    ref = add_residual_ref(x.astype(jnp.float32), residual.astype(jnp.float32),
                           w, b, gamma, beta, running_mean, running_var)
    out_f32 = out.astype(jnp.float32)
    max_err = float(jnp.max(jnp.abs(out_f32 - ref)))
    assert jnp.allclose(out_f32, ref, atol=3e-2, rtol=3e-2), max_err

    print("KERNEL_OK")
</pallas_src>

<mosaic_0001>
module attributes {stable_mosaic.version = 11 : i64} {
  func.func @_add_residual_kernel(%arg0: i32, %arg1: i32, %arg2: memref<32x4xbf16, #tpu.memory_space<vmem>>, %arg3: memref<1x4x256xbf16, #tpu.memory_space<vmem>>, %arg4: memref<1x32x256xbf16, #tpu.memory_space<vmem>>, %arg5: memref<32x1xf32, #tpu.memory_space<vmem>>, %arg6: memref<32x1xf32, #tpu.memory_space<vmem>>, %arg7: memref<1x32x256xbf16, #tpu.memory_space<vmem>>) attributes {dimension_semantics = [#tpu.dimension_semantics<parallel>, #tpu.dimension_semantics<parallel>], iteration_bounds = array<i64: 2, 1>, scalar_prefetch = 0 : i64, scratch_operands = 0 : i64, tpu.core_type = #tpu.core_type<tc>, window_params = [{pipeline_mode = #tpu.pipeline_mode<synchronous>, transform_indices = @transform_0, window_bounds = array<i64: 32, 4>}, {transform_indices = @transform_1, window_bounds = array<i64: 1, 4, 256>}, {transform_indices = @transform_2, window_bounds = array<i64: 1, 32, 256>}, {pipeline_mode = #tpu.pipeline_mode<synchronous>, transform_indices = @transform_3, window_bounds = array<i64: 32, 1>}, {pipeline_mode = #tpu.pipeline_mode<synchronous>, transform_indices = @transform_4, window_bounds = array<i64: 32, 1>}, {transform_indices = @transform_5, window_bounds = array<i64: 1, 32, 256>}]} {
    %c0 = arith.constant 0 : index
    %c0_0 = arith.constant 0 : index
    %c0_1 = arith.constant 0 : index
    %0 = vector.load %arg3[%c0, %c0_0, %c0_1] : memref<1x4x256xbf16, #tpu.memory_space<vmem>>, vector<1x4x256xbf16>
    %1 = vector.shape_cast %0 : vector<1x4x256xbf16> to vector<4x256xbf16>
    %c0_2 = arith.constant 0 : index
    %c0_3 = arith.constant 0 : index
    %2 = vector.load %arg2[%c0_2, %c0_3] : memref<32x4xbf16, #tpu.memory_space<vmem>>, vector<32x4xbf16>
    %cst = arith.constant dense<0.000000e+00> : vector<32x256xf32>
    %3 = tpu.matmul %2, %1, %cst {dimension_numbers = #tpu.dot_dimension_numbers<[1], [0], [0], [1], [0, 0, 1, 1], [], []>} : vector<32x4xbf16>, vector<4x256xbf16>, vector<32x256xf32> -> vector<32x256xf32>
    %c0_4 = arith.constant 0 : index
    %c0_5 = arith.constant 0 : index
    %c0_6 = arith.constant 0 : index
    %4 = vector.load %arg4[%c0_4, %c0_5, %c0_6] : memref<1x32x256xbf16, #tpu.memory_space<vmem>>, vector<1x32x256xbf16>
    %5 = vector.shape_cast %4 : vector<1x32x256xbf16> to vector<32x256xbf16>
    %6 = arith.extf %5 : vector<32x256xbf16> to vector<32x256xf32>
    %7 = arith.addf %3, %6 : vector<32x256xf32>
    %c0_7 = arith.constant 0 : index
    %c0_8 = arith.constant 0 : index
    %8 = vector.load %arg5[%c0_7, %c0_8] : memref<32x1xf32, #tpu.memory_space<vmem>>, vector<32x1xf32>
    %9 = vector.broadcast %8 : vector<32x1xf32> to vector<32x256xf32>
    %10 = arith.mulf %7, %9 : vector<32x256xf32>
    %c0_9 = arith.constant 0 : index
    %c0_10 = arith.constant 0 : index
    %11 = vector.load %arg6[%c0_9, %c0_10] : memref<32x1xf32, #tpu.memory_space<vmem>>, vector<32x1xf32>
    %12 = vector.broadcast %11 : vector<32x1xf32> to vector<32x256xf32>
    %13 = arith.addf %10, %12 : vector<32x256xf32>
    %cst_11 = arith.constant 0.000000e+00 : f32
    %14 = vector.broadcast %cst_11 : f32 to vector<32x256xf32>
    %15 = arith.maximumf %13, %14 : vector<32x256xf32>
    %16 = arith.truncf %15 : vector<32x256xf32> to vector<32x256xbf16>
    %c0_12 = arith.constant 0 : index
    %c0_13 = arith.constant 0 : index
    %c0_14 = arith.constant 0 : index
    %17 = vector.load %arg7[%c0_12, %c0_13, %c0_14] : memref<1x32x256xbf16, #tpu.memory_space<vmem>>, vector<1x32x256xbf16>
    %18 = vector.shape_cast %17 : vector<1x32x256xbf16> to vector<32x256xbf16>
    %19 = vector.shape_cast %16 : vector<32x256xbf16> to vector<1x32x256xbf16>
    tpu.vector_store %arg7[%c0_12, %c0_13, %c0_14], %19 {strides = array<i32>} : memref<1x32x256xbf16, #tpu.memory_space<vmem>>, vector<1x32x256xbf16>,
    return
  }
  func.func @transform_0(%arg0: i32, %arg1: i32) -> (i32, i32) {
    %c0_i32 = arith.constant 0 : i32
    %c0_i32_0 = arith.constant 0 : i32
    %c0_i32_1 = arith.constant 0 : i32
    return %c0_i32, %c0_i32_0 : i32, i32
  }
  func.func @transform_1(%arg0: i32, %arg1: i32) -> (i32, i32, i32) {
    %c0_i32 = arith.constant 0 : i32
    %c0_i32_0 = arith.constant 0 : i32
    return %arg0, %c0_i32, %arg1 : i32, i32, i32
  }
  func.func @transform_2(%arg0: i32, %arg1: i32) -> (i32, i32, i32) {
    %c0_i32 = arith.constant 0 : i32
    %c0_i32_0 = arith.constant 0 : i32
    return %arg0, %c0_i32, %arg1 : i32, i32, i32
  }
  func.func @transform_3(%arg0: i32, %arg1: i32) -> (i32, i32) {
    %c0_i32 = arith.constant 0 : i32
    %c0_i32_0 = arith.constant 0 : i32
    %c0_i32_1 = arith.constant 0 : i32
    return %c0_i32, %c0_i32_0 : i32, i32
  }
  func.func @transform_4(%arg0: i32, %arg1: i32) -> (i32, i32) {
    %c0_i32 = arith.constant 0 : i32
    %c0_i32_0 = arith.constant 0 : i32
    %c0_i32_1 = arith.constant 0 : i32
    return %c0_i32, %c0_i32_0 : i32, i32
  }
  func.func @transform_5(%arg0: i32, %arg1: i32) -> (i32, i32, i32) {
    %c0_i32 = arith.constant 0 : i32
    %c0_i32_0 = arith.constant 0 : i32
    return %arg0, %c0_i32, %arg1 : i32, i32, i32
  }
}

</mosaic_0001>

<bundles_post_ra>
// kernel: tpu_custom_call.1
= control target key start
LH: loop header
LB: loop body
LE: loop exit
PB: predicated region body
PF: predicated region fallthrough
CT: control target
= control target key end

     0   :  { %10 = vsyncpa [#allocation3], 0  ;;  %s976_s0 = inlined_call_operand.vmem [shape: bf16[32,4], index: 0, kind: input, shape index: {}]   ;;  %s977_s1 = inlined_call_operand.vmem [shape: bf16[2,4,256], index: 1, kind: input, shape index: {}]   ;;  %s978_s2 = inlined_call_operand.vmem [shape: bf16[2,32,256], index: 2, kind: input, shape index: {}]   ;;  %s979_s3 = inlined_call_operand.vmem [shape: f32[32,1], index: 3, kind: input, shape index: {}]   ;;  %s980_s4 = inlined_call_operand.vmem [shape: f32[32,1], index: 4, kind: input, shape index: {}]   ;;  %s981_s5 = inlined_call_operand.hbm [shape: bf16[2,32,256], index: 5, kind: output, shape index: {}]  }
   0x1   :  { %12 = vsyncpa [#allocation3 + $0x1], 0  ;;  %s817_s18 = smov 0   ;;  %s819_s19 = smov 0  }
   0x2   :  { %s821_s20 = smov 0   ;;  %s823_s21 = smov 0  }
   0x3   :  { %s825_s22 = smov 0   ;;  %s827_s23 = smov 0  }
   0x4 LB: > { %s607_s24 = sadd.s32 4294967295, %s781_s23   ;;  %s608_s25 = sadd.s32 4294967294, %s781_s23   ;;  %s781_s23 = sphi %s827_s23, %s18_s23   ;;  %s777_s22 = sphi %s825_s22, %s988_s22   ;;  %s773_s21 = sphi %s823_s21, %s987_s21   ;;  %s769_s20 = sphi %s821_s20, %s986_s20   ;;  %s765_s19 = sphi %s819_s19, %s985_s19   ;;  %s761_s18 = sphi %s817_s18, %s984_s18  }
   0x5   : > { %s30_s26 = sadd.s32 1, %s777_s22  ;;  %s158_s27 = sadd.s32 1, %s769_s20 }
   0x6   : > { %p32_p0 = scmp.ge.s32.totalorder %s30_s26, 2  ;;  %p168_p1 = scmp.ne.s32.totalorder %s769_s20, %s765_s19 }
   0x7   : > { %p169_p2 = scmp.eq.s32.totalorder %s607_s24, 1  ;;  %p174_p3 = scmp.ne.s32.totalorder %s765_s19, %s761_s18 }
   0x8   : > { %s990_s26 = smov (%p32_p0, %s30_s26), 0  ;;  %p175_p5 = scmp.eq.s32.totalorder %s608_s25, 1 }
   0x9   : > { %p857_p4 = por %p169_p2, %p168_p1  ;;  %s153_s29 = ssub.s32 %s777_s22, %s990_s26 }
   0xa   : > { %p611_p6 = scmp.ge.s32.totalorder %s781_s23, 1  ;;  %p156_p7 = scmp.eq.s32.totalorder %s153_s29, 0 }
   0xb   : > { %p864_p8 = por %p175_p5, %p174_p3  ;;  %p228_p9 = scmp.lt.s32.totalorder %s781_s23, 3 }
   0xc   : > { %s870_s6 = scalar_select %p156_p7, %s769_s20, %s158_s27  }
   0xd   : > { %p229_p10 = pnand %p611_p6, %p228_p9 }
   0xe   : > { %p270_p11 = scmp.lt.s32.totalorder (!%p229_p10), %s773_s21, 1  ;;  %v783_v0 = vmov (!%p229_p10), 0   ;;  %v396_v1 = vld [vmem:[%s979_s3 + $0x10] sm:$0xff] (!%p229_p10)  ;;  %v394_v2 = vld [vmem:[%s979_s3] sm:$0xff] (!%p229_p10)  ;;  %vm334_vm0 = vcmask (!%p229_p10), 1041408   ;;  %v397_v3 = vld [vmem:[%s979_s3 + $0x18] sm:$0xff] (!%p229_p10) }
   0xf   : > { %232 = sbr.rel (%p229_p10) target bundleno = 273 (0x111), region = 40  ;;  %373 = vmatprep.mubr.bf16.mxu0 (!%p229_p10), %v783_v0  ;;  %383 = vmatprep.mubr.bf16.mxu1 (!%p229_p10), %v783_v0  ;;  %v395_v4 = vld [vmem:[%s979_s3 + $0x8] sm:$0xff] (!%p229_p10)  ;;  %v426_v9 = vld [vmem:[%s980_s4] sm:$0xff] (!%p229_p10)  ;;  %vm327_vm1 = vcmask (!%p229_p10), 31744   ;;  %v429_v12 = vld [vmem:[%s980_s4 + $0x18] sm:$0xff] (!%p229_p10)  ;;  %s266_s8 = sand.u32 (!%p229_p10), 1, %s765_s19  }
  0x10   : > { %700 = vset.pattern.permute.xlu1 (!%p229_p10), %v783_v0  ;;  %699 = vset.pattern.permute.xlu0 (!%p229_p10), %v783_v0  ;;  %v427_v8 = vld [vmem:[%s980_s4 + $0x8] sm:$0xff] (!%p229_p10)  ;;  %v701_v10 = vld [vmem:[%s976_s0] sm:$0xff] (!%p229_p10)   ;;  %v428_v13 = vld [vmem:[%s980_s4 + $0x10] sm:$0xff] (!%p229_p10)  ;;  %s638_s9 = sshll.u32 (!%p229_p10), %s773_s21, 9  ;;  %s784_s16 = smov (!%p229_p10), [#allocation2]  }
  0x11   : > { %410 = vperm.xlu1 (!%p229_p10), %700, %v396_v1   ;;  %400 = vperm.xlu0 (!%p229_p10), %699, %v394_v2   ;;  %v702_v11 = vld [vmem:[%s976_s0 + $0x8] sm:$0xff] (!%p229_p10)   ;;  %s924_s14 = scalar_lea.hbm (!%p229_p10), %s981_s5, %s638_s9  ;;  %s707_s17 = sshll.u32 (!%p229_p10), %s784_s16, 4  ;;  %s708_s17 = int_to_ptr.vmem [resolvable:$false] %s707_s17 }
  0x15   : > { %415 = vperm.xlu1 (!%p229_p10), %700, %v397_v3   ;;  %405 = vperm.xlu0 (!%p229_p10), %699, %v395_v4  }
  0x16   : > { %s874_s7 = scalar_select %p270_p11, %s773_s21, 1 }
  0x17   : > { %s930_s21 = scalar_lea.sflag [#allocation3], %s266_s8 }
  0x18   : > { %s632_s12 = sshll.u32 %s874_s7, 2  ;;  %s633_s24 = sshll.u32 %s874_s7, 5 }
  0x19   : > { %s277_s25 = scalar_lea.vmem %s977_s1, %s632_s12  ;;  %437 = vperm.xlu1 %700, %v427_v8   ;;  %432 = vperm.xlu0 %699, %v426_v9   ;;  %s287_s29 = scalar_lea.vmem %s978_s2, %s633_s24 }
  0x1a   : > { %v619_v5 = vld.sshfl [vmem:[%s277_s25] sm:$0x33 pattern:$0x76325410]  ;;  %v298_v19 = vld [vmem:[%s287_s29 + $0x10] sm:$0xff]  ;;  %v297_v20 = vld [vmem:[%s287_s29 + $0x8] sm:$0xff] }
  0x1b   : > { %v326_v6 = vcombine.high %v619_v5, %v619_v5  ;;  %v336_v7 = vsel %vm334_vm0, %v619_v5, 0  ;;  %v296_v18 = vld [vmem:[%s287_s29] sm:$0xff]  ;;  %v299_v21 = vld [vmem:[%s287_s29 + $0x18] sm:$0xff]  ;;  %v304_v23 = vunpack.c.l.bf16 %v298_v19  ;;  %v305_v26 = vunpack.c.h.bf16 %v298_v19  ;;  %s917_s7 = sshll.u32 %s266_s8, 5  ;;  %s709_s24 = scalar_lea.vmem %s708_s17, 1024 }
  0x1c   : > { %v300_v22 = vunpack.c.l.bf16 %v296_v18  ;;  %v301_v25 = vunpack.c.h.bf16 %v296_v18  ;;  %v302_v28 = vunpack.c.l.bf16 %v297_v20  ;;  %v306_v29 = vunpack.c.l.bf16 %v299_v21  ;;  %s268_s10 = scalar_lea.vmem [#allocation2], %s917_s7 }
  0x1d   : > { %620 = vmatprep.subr.msk.bf16.mxu0 %vm334_vm0, %v326_v6  ;;  %639 = vmatprep.subr.msk.bf16.mxu1 %vm334_vm0, %v326_v6  ;;  %v303_v32 = vunpack.c.h.bf16 %v297_v20  ;;  %v307_v33 = vunpack.c.h.bf16 %v299_v21  ;;  %s510_s11 = sshll.u32 %s268_s10, 4  ;;  %s926_s11 = int_to_ptr.vmem [resolvable:$true] %s510_s11 }
  0x1e   : > { %342 = vmatpush1.bf16.msra.mxu0 %v336_v7  ;;  %640 = vmatpush1.bf16.msra.mxu1 %v336_v7  ;;  %s703_s15 = scalar_lea.vmem %s926_s11, 512  ;;  %p710_p1 = scmp.lt.s32.totalorder %s926_s11, %s708_s17 }
  0x1f   : > { %447 = vperm.xlu1 %700, %v429_v12   ;;  %442 = vperm.xlu0 %699, %v428_v13   ;;  %p704_p12 = scmp.ne.s32.totalorder %s926_s11, %s703_s15  ;;  %p711_p2 = scmp.lt.s32.totalorder %s709_s24, %s703_s15 }
  0x21   : > { %621 = vmatmul.mubr.msk.bf16.vlgmr.msra.gmra.mrb[0].mxu0 %vm327_vm1, %v701_v10  ;;  %622 = vmatmul.mubr.msk.bf16.vlgmr.msra.gmra.mrb[0].mxu1 %vm327_vm1, %v702_v11  ;;  %p705_p13 = pnand %p704_p12, %p857_p4  ;;  %p712_p3 = por %p711_p2, %p710_p1 }
  0x23   : > { %p706_p0 = pneg %p705_p13 }
  0x25   : > { %p713_p5 = pnand %p712_p3, %p706_p0 }
  0x90   : > { %v401_v14 = vpop.permute.xlu0 %400  ;;  %v411_v15 = vpop.permute.xlu1 %410 }
  0x94   : > { %v406_v16 = vpop.permute.xlu0 %405  ;;  %v416_v17 = vpop.permute.xlu1 %415 }
  0x98   : > { %v433_v24 = vpop.permute.xlu0 %432  ;;  %v438_v27 = vpop.permute.xlu1 %437 }
  0x9e   : > { %v443_v48 = vpop.permute.xlu0 %442  ;;  %v448_v57 = vpop.permute.xlu1 %447 }
  0xf4   : > { %v375_v30 = vpop.f32.mrb[0].mxu0  ;;  %v385_v31 = vpop.f32.mrb[0].mxu1 }
  0xf5   : > { %v376_v34 = vadd.f32 %v375_v30, %v300_v22  ;;  %v386_v35 = vadd.f32 %v385_v31, %v304_v23  ;;  %v377_v36 = vpop.f32.mrb[1].mxu0  ;;  %v387_v37 = vpop.f32.mrb[1].mxu1 }
  0xf6   : > { %v378_v38 = vadd.f32 %v377_v36, %v301_v25  ;;  %v388_v39 = vadd.f32 %v387_v37, %v305_v26  ;;  %v379_v40 = vpop.f32.mrb[2].mxu0  ;;  %v389_v41 = vpop.f32.mrb[2].mxu1 }
  0xf7   : > { %v418_v42 = vmul.f32 %v401_v14, %v376_v34  ;;  %v422_v43 = vmul.f32 %v411_v15, %v386_v35  ;;  %v380_v44 = vadd.f32 %v379_v40, %v302_v28  ;;  %v390_v45 = vadd.f32 %v389_v41, %v306_v29  ;;  %v381_v46 = vpop.f32.mrb[3].mxu0  ;;  %v391_v47 = vpop.f32.mrb[3].mxu1 }
  0xf8   : > { %v419_v49 = vmul.f32 %v401_v14, %v378_v38  ;;  %v423_v50 = vmul.f32 %v411_v15, %v388_v39  ;;  %v382_v51 = vadd.f32 %v381_v46, %v303_v32  ;;  %v392_v52 = vadd.f32 %v391_v47, %v307_v33 }
  0xf9   : > { %v450_v53 = vadd.f32 %v433_v24, %v418_v42  ;;  %v454_v54 = vadd.f32 %v443_v48, %v422_v43  ;;  %v420_v55 = vmul.f32 %v406_v16, %v380_v44  ;;  %v424_v56 = vmul.f32 %v416_v17, %v390_v45 }
  0xfa   : > { %v451_v58 = vadd.f32 %v433_v24, %v419_v49  ;;  %v455_v59 = vadd.f32 %v443_v48, %v423_v50  ;;  %v421_v60 = vmul.f32 %v406_v16, %v382_v51  ;;  %v425_v61 = vmul.f32 %v416_v17, %v392_v52 }
  0xfb   : > { %v458_v62 = vmax.f32 %v450_v53, 0.0  ;;  %v462_v63 = vmax.f32 %v454_v54, 0.0  ;;  %v452_v0 = vadd.f32 %v438_v27, %v420_v55  ;;  %v456_v1 = vadd.f32 %v448_v57, %v424_v56 }
  0xfc   : > { %v459_v2 = vmax.f32 %v451_v58, 0.0  ;;  %v463_v3 = vmax.f32 %v455_v59, 0.0  ;;  %v453_v4 = vadd.f32 %v438_v27, %v421_v60  ;;  %v457_v5 = vadd.f32 %v448_v57, %v425_v61 }
  0xfd   : > { %v460_v6 = vmax.f32 %v452_v0, 0.0  ;;  %v464_v7 = vmax.f32 %v456_v1, 0.0 }
  0xfe   : > { %v634_v8 = vpack.c.bf16 %v459_v2, %v458_v62  ;;  %v636_v9 = vpack.c.bf16 %v463_v3, %v462_v63  ;;  %v461_v10 = vmax.f32 %v453_v4, 0.0  ;;  %v465_v11 = vmax.f32 %v457_v5, 0.0 }
 0x100   : > { %490 = vst [vmem:[%s268_s10] sm:$0xff] %v634_v8  ;;  %492 = vst [vmem:[%s268_s10 + $0x10] sm:$0xff] %v636_v9  ;;  %v635_v12 = vpack.c.bf16 %v461_v10, %v460_v6  ;;  %v637_v13 = vpack.c.bf16 %v465_v11, %v464_v7 }
 0x102   : > { %491 = vst [vmem:[%s268_s10 + $0x8] sm:$0xff] %v635_v12  ;;  %493 = vst [vmem:[%s268_s10 + $0x18] sm:$0xff] %v637_v13 }
 0x103   : > { %716 = shalt.err (!%p713_p5)
}
 0x104   : > { %s717_s25 = scalar_lea.hbm %s924_s14, 512  ;;  %s721_s8 = scalar_lea.hbm %s981_s5, 1024 }
 0x105   : > { %p718_p6 = scmp.ne.s32.totalorder %s924_s14, %s717_s25  ;;  %p722_p10 = scmp.lt.u32.totalorder %s924_s14, %s981_s5 }
 0x106   : > { %p723_p11 = scmp.lt.u32.totalorder %s721_s8, %s717_s25  ;;  %p725_p13 = scmp.lt.u32.totalorder %s717_s25, %s924_s14 }
 0x107   : > { %p719_p7 = pnand %p718_p6, %p857_p4 }
 0x108   : > { %p724_p12 = por %p723_p11, %p722_p10 }
 0x109   : > { %p720_p9 = pneg %p719_p7 }
 0x10a   : > { %p726_p0 = por %p725_p13, %p724_p12 }
 0x10c   : > { %p727_p1 = pnand %p726_p0, %p720_p9 }
 0x10e   : > { %730 = shalt.err (!%p727_p1)
}
 0x10f   : > { %s785_s10 = smov 128   ;;  %s786_s12 = smov 8  }
 0x110   : > { %641 = dma.vmem_to_hbm [thread:$0]  (%p857_p4), %s926_s11, 512, %s924_s14, %s930_s21, %s785_s10, %s785_s10, %s786_s12  }
 0x111 PF: > { %p647_p2 = scmp.ge.s32.totalorder %s781_s23, 2  ;;  %s525_s13 = sand.u32 1, %s761_s18  }
 0x112   : > { %s526_s15 = scalar_lea.sflag [#allocation3], %s525_s13 }
 0x113   : > { %p644_p3 = pnand %p647_p2, %p864_p8 }
 0x115   : > { %756 = dma.done.wait (!%p644_p3), %s526_s15, 512  }
 0x116   : > { %758 = vsyncadd (!%p644_p3), %s526_s15, 4294966784  ;;  %s18_s23 = sadd.s32 1, %s781_s23   ;;  %s984_s18 = smov %s765_s19 }
 0x117   : > { %p15_p5 = scmp.ge.s32.totalorder %s18_s23, 4   ;;  %s985_s19 = smov %s769_s20 }
 0x118   : > { %s986_s20 = smov %s870_s6  ;;  %s987_s21 = smov %s777_s22 }
 0x119   : > { %s988_s22 = smov %s990_s26  ;;  %17 = sbr.rel (!%p15_p5) target bundleno = 4 (0x4), region = 78 }
 0x120   :  { %531 = vsyncpa [#allocation3], 1 }
 0x121   :  { %533 = vsyncpa [#allocation3 + $0x1], 1 }

</bundles_post_ra>
